<compile_context>
chip_gen: v7x
topology: tpu7x:2x2x1
jax: 0.10.0
libtpu: 0.0.40
codegen_flags: <defaults>
</compile_context>

<pallas_src>
import functools

import jax
import jax.numpy as jnp
from jax.experimental import pallas as pl
from jax.experimental.pallas import tpu as pltpu


def _round_up(x, m):
    return (x + m - 1) // m * m


def _store_score(node_out_ref, neigh_out_ref, bias_ref, sb_ref, bt):
    """score = clamp(rowsum(node*neigh) + bias, -10, 10), packed lane-dense."""
    ne = node_out_ref[...].astype(jnp.float32)          # (bt, D)
    me = neigh_out_ref[...].astype(jnp.float32)         # (bt, D)
    s = jnp.sum(ne * me, axis=1, keepdims=True) + bias_ref[...]   # (bt, 1)
    s = jnp.clip(s, -10.0, 10.0)
    if bt < 128:                                        # static pad to a full lane row
        s = jnp.concatenate([s, jnp.zeros((128 - bt, 1), jnp.float32)], axis=0)
    row = s.reshape(1, 128)                             # sublane -> lane (tiny relayout)
    sb_ref[...] = jnp.broadcast_to(row, (8, 128)).reshape(1, 8, 128)


def _fast_kernel(bt, nid_ref, mid_ref, emb_ref, bias_ref,
                 node_out_ref, neigh_out_ref, sb_ref):
    """Small-table path: whole embedding table resident in VMEM, in-kernel row gather."""
    base = pl.program_id(0) * bt

    @pl.loop(0, bt)
    def _gather(r):
        n = nid_ref[base + r]
        m = mid_ref[base + r]
        node_out_ref[pl.ds(r, 1), :] = emb_ref[pl.ds(n, 1), :]
        neigh_out_ref[pl.ds(r, 1), :] = emb_ref[pl.ds(m, 1), :]

    _store_score(node_out_ref, neigh_out_ref, bias_ref, sb_ref, bt)


def _dma_kernel(bt, nid_ref, mid_ref, emb_hbm, bias_ref,
                node_out_ref, neigh_out_ref, sb_ref, sem):
    """Large-table path: table stays in HBM, per-row DMA gather directly into the
    pipelined output blocks, one bulk wait per stream."""
    base = pl.program_id(0) * bt

    # Issue all 2*bt row gathers up front so their latencies overlap.
    # (Padded tail rows gather row 0 - cheaper than breaking the bulk-wait byte count.)
    @pl.loop(0, bt)
    def _issue(r):
        n = nid_ref[base + r]
        m = mid_ref[base + r]
        pltpu.make_async_copy(emb_hbm.at[pl.ds(n, 1), :],
                              node_out_ref.at[pl.ds(r, 1), :], sem.at[0]).start()
        pltpu.make_async_copy(emb_hbm.at[pl.ds(m, 1), :],
                              neigh_out_ref.at[pl.ds(r, 1), :], sem.at[1]).start()

    # Bulk drain: DMA semaphores count bytes, so one (bt, D)-sized wait per stream
    # drains all bt row copies of that stream.
    pltpu.make_async_copy(node_out_ref, node_out_ref, sem.at[0]).wait()
    pltpu.make_async_copy(neigh_out_ref, neigh_out_ref, sem.at[1]).wait()

    _store_score(node_out_ref, neigh_out_ref, bias_ref, sb_ref, bt)


def discriminator_forward(node_id, node_neighbor_id, embedding_matrix, bias_vector,
                          *, vmem_table_bytes=4 * 1024 * 1024):
    """Pallas equivalent of Discriminator.forward.

    node_id, node_neighbor_id : (B,) int
    embedding_matrix          : (N, D) float
    bias_vector               : (N,)   float
    returns (score (B,) f32, node_emb (B,D), neigh_emb (B,D), bias (B,) f32)
    """
    N, D = embedding_matrix.shape
    B = node_id.shape[0]
    emb_dtype = embedding_matrix.dtype

    # Batch tiling: bt <= 128 (one lane row of scores per block); for B > 64 split into
    # >= 2 blocks so both v7x TensorCores get work under ("parallel",).
    if B <= 64:
        bt = _round_up(B, 8)
    else:
        bt = min(128, _round_up((B + 1) // 2, 8))
    b_pad = _round_up(B, bt)
    grid = (b_pad // bt,)
    num_blocks = grid[0]

    nid = jnp.pad(node_id.astype(jnp.int32), (0, b_pad - B))        # pad with id 0 (valid)
    mid = jnp.pad(node_neighbor_id.astype(jnp.int32), (0, b_pad - B))

    # Bias gather is O(B): do it with plain XLA and feed the column to the kernel.
    bias_g = bias_vector[node_neighbor_id].astype(jnp.float32)      # (B,)
    bias_col = jnp.pad(bias_g, (0, b_pad - B)).reshape(b_pad, 1)    # (b_pad, 1)

    out_shapes = (
        jax.ShapeDtypeStruct((b_pad, D), emb_dtype),                # node_embedding
        jax.ShapeDtypeStruct((b_pad, D), emb_dtype),                # node_neighbor_embedding
        jax.ShapeDtypeStruct((num_blocks, 8, 128), jnp.float32),    # lane-dense score tiles
    )
    out_specs = [
        pl.BlockSpec((bt, D), lambda i, nid, mid: (i, 0)),
        pl.BlockSpec((bt, D), lambda i, nid, mid: (i, 0)),
        pl.BlockSpec((1, 8, 128), lambda i, nid, mid: (i, 0, 0)),
    ]
    bias_spec = pl.BlockSpec((bt, 1), lambda i, nid, mid: (i, 0))

    table_bytes = N * D * embedding_matrix.dtype.itemsize
    if table_bytes <= vmem_table_bytes:
        # Fast path: table resident in VMEM, in-kernel gather (no manual DMAs).
        grid_spec = pltpu.PrefetchScalarGridSpec(
            num_scalar_prefetch=2,                                  # nid, mid -> SMEM
            grid=grid,
            in_specs=[pl.BlockSpec((N, D), lambda i, nid, mid: (0, 0)), bias_spec],
            out_specs=out_specs,
        )
        kernel = functools.partial(_fast_kernel, bt)
    else:
        # General path: table stays in HBM; O(B*D) gather traffic via per-row DMAs.
        grid_spec = pltpu.PrefetchScalarGridSpec(
            num_scalar_prefetch=2,
            grid=grid,
            in_specs=[pl.BlockSpec(memory_space=pl.ANY), bias_spec],
            out_specs=out_specs,
            scratch_shapes=[pltpu.SemaphoreType.DMA((2,))],         # one sem per stream
        )
        kernel = functools.partial(_dma_kernel, bt)

    node_emb, neigh_emb, sb = pl.pallas_call(
        kernel,
        out_shape=out_shapes,
        grid_spec=grid_spec,
        compiler_params=pltpu.CompilerParams(
            dimension_semantics=("parallel",)),                     # blocks split across TCs
    )(nid, mid, embedding_matrix, bias_col)

    score = sb[:, 0, :bt].reshape(num_blocks * bt)[:B]
    return score, node_emb[:B], neigh_emb[:B], bias_g


def _reference_forward(node_id, node_neighbor_id, embedding_matrix, bias_vector):
    node_emb = embedding_matrix[node_id]
    neigh_emb = embedding_matrix[node_neighbor_id]
    bias = bias_vector[node_neighbor_id]
    score = jnp.clip(jnp.sum(node_emb * neigh_emb, axis=1) + bias, -10.0, 10.0)
    return score, node_emb, neigh_emb, bias


if __name__ == "__main__":
    N_NODE = 64     # n_node
    EMB_DIM = 32    # node_emd_init.shape[1]

    key = jax.random.PRNGKey(0)
    k_emb, k_bias, k1, k2, k3, k4 = jax.random.split(key, 6)

    # Parameters (reset_parameters sets bias to zeros; use a nonzero bias here so the
    # bias path is actually verified).
    embedding_matrix = jax.random.normal(k_emb, (N_NODE, EMB_DIM), dtype=jnp.float32)
    bias_vector = 0.1 * jax.random.normal(k_bias, (N_NODE,), dtype=jnp.float32)

    def run_case(batch, kn, km, **kw):
        node_id = jax.random.randint(kn, (batch,), 0, N_NODE, dtype=jnp.int32)
        node_neighbor_id = jax.random.randint(km, (batch,), 0, N_NODE, dtype=jnp.int32)
        out = discriminator_forward(node_id, node_neighbor_id,
                                    embedding_matrix, bias_vector, **kw)
        jax.block_until_ready(out)
        ref = _reference_forward(node_id, node_neighbor_id,
                                 embedding_matrix, bias_vector)
        for o, r in zip(out, ref):
            assert o.shape == r.shape, (o.shape, r.shape)
            assert jnp.allclose(o, r, atol=1e-5)

    # Small batch, VMEM-resident fast path (single block, bt < 128).
    run_case(8, k1, k2)
    # Larger batch, VMEM-resident fast path (multi-block, bt == 128).
    run_case(300, k3, k4)
    # Force the HBM DMA-gather path (large-table code path) for verification.
    run_case(200, k1, k3, vmem_table_bytes=0)

    print("KERNEL_OK")
</pallas_src>

<mosaic_0001>
module attributes {stable_mosaic.version = 11 : i64} {
  func.func @_fast_kernel(%arg0: i32, %arg1: memref<8xi32, #tpu.memory_space<smem>>, %arg2: memref<8xi32, #tpu.memory_space<smem>>, %arg3: memref<64x32xf32, #tpu.memory_space<vmem>>, %arg4: memref<8x1xf32, #tpu.memory_space<vmem>>, %arg5: memref<8x32xf32, #tpu.memory_space<vmem>>, %arg6: memref<8x32xf32, #tpu.memory_space<vmem>>, %arg7: memref<1x8x128xf32, #tpu.memory_space<vmem>>) attributes {dimension_semantics = [#tpu.dimension_semantics<parallel>], iteration_bounds = array<i64: 1>, scalar_prefetch = 2 : i64, scratch_operands = 0 : i64, tpu.core_type = #tpu.core_type<tc>, window_params = [{pipeline_mode = #tpu.pipeline_mode<synchronous>, transform_indices = @transform_0, window_bounds = array<i64: 64, 32>}, {transform_indices = @transform_1, window_bounds = array<i64: 8, 1>}, {transform_indices = @transform_2, window_bounds = array<i64: 8, 32>}, {transform_indices = @transform_3, window_bounds = array<i64: 8, 32>}, {transform_indices = @transform_4, window_bounds = array<i64: 1, 8, 128>}]} {
    %c8_i32 = arith.constant 8 : i32
    %0 = arith.muli %arg0, %c8_i32 : i32
    %c0_i32 = arith.constant 0 : i32
    %c8_i32_0 = arith.constant 8 : i32
    %1 = arith.addi %c0_i32, %c8_i32_0 : i32
    %c1_i32 = arith.constant 1 : i32
    scf.for %arg8 = %c0_i32 to %1 step %c1_i32  : i32 {
      %c1_i32_13 = arith.constant 1 : i32
      %20 = arith.muli %arg8, %c1_i32_13 : i32
      %c0_i32_14 = arith.constant 0 : i32
      %21 = arith.addi %c0_i32_14, %20 : i32
      %22 = arith.addi %0, %21 : i32
      %23 = arith.index_cast %22 : i32 to index
      %24 = memref.load %arg1[%23] : memref<8xi32, #tpu.memory_space<smem>>
      %25 = arith.addi %0, %21 : i32
      %26 = arith.index_cast %25 : i32 to index
      %27 = memref.load %arg2[%26] : memref<8xi32, #tpu.memory_space<smem>>
      %28 = arith.index_cast %24 : i32 to index
      %c0_15 = arith.constant 0 : index
      %29 = vector.load %arg3[%28, %c0_15] : memref<64x32xf32, #tpu.memory_space<vmem>>, vector<1x32xf32>
      %30 = arith.index_cast %21 : i32 to index
      %c0_16 = arith.constant 0 : index
      %31 = vector.load %arg5[%30, %c0_16] : memref<8x32xf32, #tpu.memory_space<vmem>>, vector<1x32xf32>
      tpu.vector_store %arg5[%30, %c0_16], %29 {strides = array<i32>} : memref<8x32xf32, #tpu.memory_space<vmem>>, vector<1x32xf32>,
      %32 = arith.index_cast %27 : i32 to index
      %c0_17 = arith.constant 0 : index
      %33 = vector.load %arg3[%32, %c0_17] : memref<64x32xf32, #tpu.memory_space<vmem>>, vector<1x32xf32>
      %34 = arith.index_cast %21 : i32 to index
      %c0_18 = arith.constant 0 : index
      %35 = vector.load %arg6[%34, %c0_18] : memref<8x32xf32, #tpu.memory_space<vmem>>, vector<1x32xf32>
      tpu.vector_store %arg6[%34, %c0_18], %33 {strides = array<i32>} : memref<8x32xf32, #tpu.memory_space<vmem>>, vector<1x32xf32>,
    }
    %c8_i32_1 = arith.constant 8 : i32
    %c0 = arith.constant 0 : index
    %c0_2 = arith.constant 0 : index
    %2 = vector.load %arg5[%c0, %c0_2] : memref<8x32xf32, #tpu.memory_space<vmem>>, vector<8x32xf32>
    %c0_3 = arith.constant 0 : index
    %c0_4 = arith.constant 0 : index
    %3 = vector.load %arg6[%c0_3, %c0_4] : memref<8x32xf32, #tpu.memory_space<vmem>>, vector<8x32xf32>
    %4 = arith.mulf %2, %3 : vector<8x32xf32>
    %cst = arith.constant dense<0.000000e+00> : vector<8xf32>
    %5 = vector.multi_reduction <add>, %4, %cst [1] : vector<8x32xf32> to vector<8xf32>
    %6 = vector.shape_cast %5 : vector<8xf32> to vector<8x1xf32>
    %c0_5 = arith.constant 0 : index
    %c0_6 = arith.constant 0 : index
    %7 = vector.load %arg4[%c0_5, %c0_6] : memref<8x1xf32, #tpu.memory_space<vmem>>, vector<8x1xf32>
    %8 = arith.addf %6, %7 : vector<8x1xf32>
    %cst_7 = arith.constant -1.000000e+01 : f32
    %cst_8 = arith.constant 1.000000e+01 : f32
    %9 = vector.broadcast %cst_7 : f32 to vector<8x1xf32>
    %10 = arith.maximumf %9, %8 : vector<8x1xf32>
    %11 = vector.broadcast %cst_8 : f32 to vector<8x1xf32>
    %12 = arith.minimumf %11, %10 : vector<8x1xf32>
    %cst_9 = arith.constant 0.000000e+00 : f32
    %13 = vector.broadcast %cst_9 : f32 to vector<120x1xf32>
    %14 = tpu.concatenate %12, %13 in 0 : vector<8x1xf32>, vector<120x1xf32> -> vector<128x1xf32>
    %15 = vector.shape_cast %14 : vector<128x1xf32> to vector<1x128xf32>
    %16 = vector.shape_cast %15 : vector<1x128xf32> to vector<1x128xf32>
    %17 = vector.broadcast %16 : vector<1x128xf32> to vector<8x128xf32>
    %18 = vector.shape_cast %17 : vector<8x128xf32> to vector<1x8x128xf32>
    %c0_10 = arith.constant 0 : index
    %c0_11 = arith.constant 0 : index
    %c0_12 = arith.constant 0 : index
    %19 = vector.load %arg7[%c0_10, %c0_11, %c0_12] : memref<1x8x128xf32, #tpu.memory_space<vmem>>, vector<1x8x128xf32>
    tpu.vector_store %arg7[%c0_10, %c0_11, %c0_12], %18 {strides = array<i32>} : memref<1x8x128xf32, #tpu.memory_space<vmem>>, vector<1x8x128xf32>,
    return
  }
  func.func @transform_0(%arg0: i32, %arg1: memref<8xi32, #tpu.memory_space<smem>>, %arg2: memref<8xi32, #tpu.memory_space<smem>>) -> (i32, i32) {
    %c0_i32 = arith.constant 0 : i32
    %c0_i32_0 = arith.constant 0 : i32
    %c0_i32_1 = arith.constant 0 : i32
    return %c0_i32, %c0_i32_0 : i32, i32
  }
  func.func @transform_1(%arg0: i32, %arg1: memref<8xi32, #tpu.memory_space<smem>>, %arg2: memref<8xi32, #tpu.memory_space<smem>>) -> (i32, i32) {
    %c0_i32 = arith.constant 0 : i32
    %c0_i32_0 = arith.constant 0 : i32
    return %arg0, %c0_i32 : i32, i32
  }
  func.func @transform_2(%arg0: i32, %arg1: memref<8xi32, #tpu.memory_space<smem>>, %arg2: memref<8xi32, #tpu.memory_space<smem>>) -> (i32, i32) {
    %c0_i32 = arith.constant 0 : i32
    %c0_i32_0 = arith.constant 0 : i32
    return %arg0, %c0_i32 : i32, i32
  }
  func.func @transform_3(%arg0: i32, %arg1: memref<8xi32, #tpu.memory_space<smem>>, %arg2: memref<8xi32, #tpu.memory_space<smem>>) -> (i32, i32) {
    %c0_i32 = arith.constant 0 : i32
    %c0_i32_0 = arith.constant 0 : i32
    return %arg0, %c0_i32 : i32, i32
  }
  func.func @transform_4(%arg0: i32, %arg1: memref<8xi32, #tpu.memory_space<smem>>, %arg2: memref<8xi32, #tpu.memory_space<smem>>) -> (i32, i32, i32) {
    %c0_i32 = arith.constant 0 : i32
    %c0_i32_0 = arith.constant 0 : i32
    %c0_i32_1 = arith.constant 0 : i32
    return %arg0, %c0_i32, %c0_i32_0 : i32, i32, i32
  }
}

</mosaic_0001>

<bundles_post_ra>
// kernel: tpu_custom_call.1
= control target key start
LH: loop header
LB: loop body
LE: loop exit
PB: predicated region body
PF: predicated region fallthrough
CT: control target
= control target key end

     0   :  { %s479_s0 = inlined_call_operand.vmem [shape: s32[8], index: 0, kind: input, shape index: {}]   ;;  %s480_s2 = inlined_call_operand.vmem [shape: f32[64,32], index: 2, kind: input, shape index: {}]   ;;  %s481_s3 = inlined_call_operand.vmem [shape: f32[8,1], index: 3, kind: input, shape index: {}]   ;;  %s482_s4 = inlined_call_operand.hbm [shape: f32[8,32], index: 4, kind: output, shape index: {0}]   ;;  %s483_s5 = inlined_call_operand.hbm [shape: f32[8,32], index: 5, kind: output, shape index: {1}]   ;;  %s484_s6 = inlined_call_operand.hbm [shape: f32[1,8,128], index: 6, kind: output, shape index: {2}]   ;;  %s485_s1 = inlined_call_operand.vmem [shape: s32[8], index: 1, kind: input, shape index: {}]  }
   0x1   :  { %s12_s23 = sshll.u32 %s479_s0, 4  ;;  %s16_s26 = sshll.u32 %s485_s1, 4  ;;  %s13_s23 = int_to_ptr.vmem [resolvable:$true] %s12_s23  ;;  %s17_s26 = int_to_ptr.vmem [resolvable:$true] %s16_s26 }
   0x2   :  { %s258_s27 = scalar_lea.vmem %s13_s23, 16  ;;  %p263_p1 = scmp.lt.s32.totalorder %s13_s23, %s13_s23 }
   0x3   :  { %p259_p0 = scmp.ne.s32.totalorder %s13_s23, %s258_s27  ;;  %p264_p2 = scmp.lt.s32.totalorder %s258_s27, %s258_s27 }
   0x5   :  { %p265_p3 = por %p264_p2, %p263_p1 }
   0x7   :  { %p266_p4 = pnand %p265_p3, %p259_p0 }
   0x9   :  { %269 = shalt.err (!%p266_p4)  }
   0xa   :  { %s362_s28 = smov [#allocation3]   ;;  %s270_s29 = scalar_lea.vmem %s17_s26, 16 }
   0xb   :  { %15 = dma.vmem_to_smem %s13_s23, 16, %s362_s28, [#allocation2] }
   0xc   :  { %p271_p5 = scmp.ne.s32.totalorder %s17_s26, %s270_s29  ;;  %p275_p6 = scmp.lt.s32.totalorder %s17_s26, %s17_s26 }
   0xd   :  { %p276_p7 = scmp.lt.s32.totalorder %s270_s29, %s270_s29 }
   0xf   :  { %p277_p8 = por %p276_p7, %p275_p6 }
  0x11   :  { %p278_p9 = pnand %p277_p8, %p271_p5 }
  0x13   :  { %281 = shalt.err (!%p278_p9)  }
  0x14   :  { %s363_s0 = smov [#allocation4]  }
  0x15   :  { %19 = dma.vmem_to_smem %s17_s26, 16, %s363_s0, [#allocation2] }
  0x16   :  { %352 = dma.done.wait [#allocation2], 32 }
  0x17   :  { %353 = vsyncadd [#allocation2], 4294967264 }
  0x18   :  { %21 = sfence }
  0x19   :  { %22 = vsyncpa [#allocation6], 0 }
  0x1a   :  { %23 = vsyncpa [#allocation8], 0  ;;  %s358_s1 = smov 0  }
  0x1b LB: > { %s36_s30 = sld [smem:[#allocation3 + %s360_s1]]  ;;  %vm41_vm0 = vcmask 253952   ;;  %s40_s14 = scalar_lea.vmem [#allocation5], %s360_s1  ;;  %s360_s1 = sphi %s358_s1, %s34_s1  }
  0x1c   : > { %s37_s7 = sld [smem:[#allocation4 + %s360_s1]]  ;;  %s45_s15 = scalar_lea.vmem [#allocation7], %s360_s1 }
  0x1d   : > { %s34_s1 = sadd.s32 1, %s360_s1  }
  0x1e   : > { %p31_p10 = scmp.ge.s32.totalorder %s34_s1, 8  }
  0x1f   :  { %vm50_vm1 = vcmask (%p31_p10), 261120   ;;  %v364_v6 = vmov (%p31_p10), 0   ;;  %v54_v7 = vld [vmem:[%s481_s3] sm:$0xff] (%p31_p10)  ;;  %s365_s18 = smov (%p31_p10), [#allocation7]   ;;  %s366_s20 = smov (%p31_p10), [#allocation5]  }
  0x20   :  { %33 = sbr.rel (!%p31_p10) target bundleno = 27 (0x1b), region = 55  ;;  %257 = vset.pattern.permute.xlu0 (%p31_p10), %v364_v6  ;;  %s207_s19 = sshll.u32 (%p31_p10), %s365_s18, 4  ;;  %s208_s19 = int_to_ptr.vmem [resolvable:$true] %s207_s19 }
  0x21   : > { %s38_s10 = scalar_lea.vmem %s480_s2, %s36_s30  ;;  %s197_s21 = sshll.u32 (%p31_p10), %s366_s20, 4  ;;  %s198_s21 = int_to_ptr.vmem [resolvable:$true] %s197_s21 }
  0x22   : > { %v39_v0 = vld [vmem:[%s38_s10] sm:$0x1]  ;;  %s43_s13 = scalar_lea.vmem %s480_s2, %s37_s7  ;;  %s282_s2 = scalar_lea.vmem (%p31_p10), %s208_s19, 128 }
  0x23   : > { %42 = vst.msk [vmem:[%s40_s14] sm:$0x1] %vm41_vm0, %v39_v0  ;;  %v44_v1 = vld [vmem:[%s43_s13] sm:$0x1]  ;;  %p283_p11 = scmp.ne.s32.totalorder (%p31_p10), %s208_s19, %s282_s2  ;;  %p287_p12 = scmp.lt.s32.totalorder (%p31_p10), %s208_s19, %s208_s19 }
  0x24   : > { %46 = vst.msk [vmem:[%s45_s15] sm:$0x1] %vm41_vm0, %v44_v1  ;;  %p288_p13 = scmp.lt.s32.totalorder (%p31_p10), %s282_s2, %s282_s2 }
  0x26   :  { %p289_p0 = por (%p31_p10), %p288_p13, %p287_p12 }
  0x28   :  { %p290_p1 = pnand %p289_p0, %p283_p11 }
  0x2a   :  { %v47_v2 = vld [vmem:[#allocation5] sm:$0xff] }
  0x2b   :  { %v48_v3 = vld [vmem:[#allocation7] sm:$0xff] }
  0x2c   :  { %v49_v4 = vmul.f32 %v48_v3, %v47_v2 }
  0x2e   :  { %v51_v5 = vsel %vm50_vm1, %v49_v4, 0.0 }
  0x2f   :  { %52 = vadd.xlane.f32.xlu0 %v51_v5 }
  0xbc   :  { %v53_v8 = vpop.xlane.xlu0 %52 }
  0xbd   :  { %v55_v9 = vadd.f32 %v54_v7, %v53_v8 }
  0xbf   :  { %v241_v10 = vclamps-f32 %v55_v9, 10.0 }
  0xc1   :  { %61 = vperm.xlu0 %257, %v241_v10  }
  0xc2   :  { %293 = shalt.err (!%p290_p1)
}
  0xc3   :  { %s294_s3 = scalar_lea.hbm %s483_s5, 128 }
  0xc4   :  { %p295_p2 = scmp.ne.s32.totalorder %s483_s5, %s294_s3  ;;  %p298_p3 = scmp.lt.u32.totalorder %s294_s3, %s483_s5 }
  0xc6   :  { %p300_p4 = pnand %p298_p3, %p295_p2 }
  0xc8   :  { %303 = shalt.err (!%p300_p4)
}
  0xc9   :  { %210 = dma.vmem_to_hbm [thread:$0]  %s208_s19, 128, %s483_s5, [#allocation8]  }
  0xca   :  { %s304_s0 = scalar_lea.vmem %s198_s21, 128  ;;  %p309_p6 = scmp.lt.s32.totalorder %s198_s21, %s198_s21 }
  0xcb   :  { %p305_p5 = scmp.ne.s32.totalorder %s198_s21, %s304_s0  ;;  %p310_p7 = scmp.lt.s32.totalorder %s304_s0, %s304_s0 }
  0xcd   :  { %p311_p8 = por %p310_p7, %p309_p6 }
  0xcf   :  { %p312_p9 = pnand %p311_p8, %p305_p5 }
  0xd1   :  { %315 = shalt.err (!%p312_p9)
}
  0xd2   :  { %s316_s7 = scalar_lea.hbm %s482_s4, 128 }
  0xd3   :  { %p317_p10 = scmp.ne.s32.totalorder %s482_s4, %s316_s7  ;;  %p320_p11 = scmp.lt.u32.totalorder %s316_s7, %s482_s4 }
  0xd5   :  { %p322_p12 = pnand %p320_p11, %p317_p10 }
  0xd7   :  { %325 = shalt.err (!%p322_p12)
}
  0xd8   :  { %200 = dma.vmem_to_hbm [thread:$0]  %s198_s21, 128, %s482_s4, [#allocation6]   ;;  %v66_v11 = vlaneseq  ;;  %vm77_vm2 = vcmask 130112   ;;  %vm84_vm3 = vcmask 195712   ;;  %vm91_vm4 = vcmask 261312  }
  0xd9   :  { %v367_v27 = vmov 0.0   ;;  %vm98_vm5 = vcmask 326912   ;;  %vm105_vm6 = vcmask 392512   ;;  %vm112_vm7 = vcmask 458112   ;;  %s368_s4 = smov [#allocation9]  }
  0xda   :  { %v67_v12 = vand.u32 127, %v66_v11  ;;  %v443_v13 = vshrl.u32 %v66_v11, 7  ;;  %vm119_vm8 = vcmask 523712   ;;  %vm126_vm9 = vcmask 589312   ;;  %s217_s13 = sshll.u32 %s368_s4, 4  ;;  %s218_s13 = int_to_ptr.vmem [resolvable:$true] %s217_s13 }
  0xdb   :  { %vm133_vm10 = vcmask 654912   ;;  %vm140_vm11 = vcmask 720512   ;;  %vm147_vm12 = vcmask 786112   ;;  %vm154_vm13 = vcmask 851712   ;;  %s326_s14 = scalar_lea.vmem %s218_s13, 128  ;;  %p331_p0 = scmp.lt.s32.totalorder %s218_s13, %s218_s13 }
  0xdc   :  { %v72_v14 = vadd.s32 4294967288, %v67_v12  ;;  %v79_v15 = vadd.s32 4294967280, %v67_v12  ;;  %v86_v16 = vadd.s32 4294967272, %v67_v12  ;;  %v93_v17 = vadd.s32 4294967264, %v67_v12  ;;  %p327_p13 = scmp.ne.s32.totalorder %s218_s13, %s326_s14  ;;  %p332_p1 = scmp.lt.s32.totalorder %s326_s14, %s326_s14 }
  0xdd   :  { %v100_v19 = vadd.s32 4294967256, %v67_v12  ;;  %v107_v21 = vadd.s32 4294967248, %v67_v12  ;;  %v70_v22 = vsub.s32 %v67_v12, %v443_v13  ;;  %v114_v24 = vadd.s32 4294967240, %v67_v12 }
  0xde   :  { %v75_v18 = vsub.s32 %v72_v14, %v443_v13  ;;  %v82_v20 = vsub.s32 %v79_v15, %v443_v13  ;;  %v89_v23 = vsub.s32 %v86_v16, %v443_v13  ;;  %v96_v25 = vsub.s32 %v93_v17, %v443_v13  ;;  %p333_p2 = por %p332_p1, %p331_p0 }
  0xdf   :  { %v121_v26 = vadd.s32 4294967232, %v67_v12  ;;  %v103_v29 = vsub.s32 %v100_v19, %v443_v13  ;;  %v128_v30 = vadd.s32 4294967224, %v67_v12  ;;  %v110_v32 = vsub.s32 %v107_v21, %v443_v13 }
  0xe0   :  { %v76_v28 = vrot.slane %v367_v27, %v75_v18  ;;  %v83_v31 = vrot.slane %v367_v27, %v82_v20  ;;  %v135_v34 = vadd.s32 4294967216, %v67_v12  ;;  %v90_v35 = vrot.slane %v367_v27, %v89_v23  ;;  %p334_p3 = pnand %p333_p2, %p327_p13 }
  0xe1   :  { %v117_v36 = vsub.s32 %v114_v24, %v443_v13  ;;  %v142_v38 = vadd.s32 4294967208, %v67_v12  ;;  %v97_v39 = vrot.slane %v367_v27, %v96_v25  ;;  %v124_v40 = vsub.s32 %v121_v26, %v443_v13 }
  0xe2   :  { %v149_v41 = vadd.s32 4294967200, %v67_v12  ;;  %v104_v42 = vrot.slane %v367_v27, %v103_v29  ;;  %v131_v44 = vsub.s32 %v128_v30, %v443_v13  ;;  %v156_v45 = vadd.s32 4294967192, %v67_v12 }
  0xe3   :  { %v111_v46 = vrot.slane %v367_v27, %v110_v32  ;;  %v138_v48 = vsub.s32 %v135_v34, %v443_v13  ;;  %v163_v49 = vadd.s32 4294967184, %v67_v12  ;;  %v118_v50 = vrot.slane %v367_v27, %v117_v36 }
  0xe4   :  { %v145_v52 = vsub.s32 %v142_v38, %v443_v13  ;;  %v170_v53 = vadd.s32 4294967176, %v67_v12  ;;  %v125_v55 = vrot.slane %v367_v27, %v124_v40  ;;  %v152_v56 = vsub.s32 %v149_v41, %v443_v13 }
  0xe5   :  { %v132_v58 = vrot.slane %v367_v27, %v131_v44  ;;  %v159_v59 = vsub.s32 %v156_v45, %v443_v13  ;;  %v139_v61 = vrot.slane %v367_v27, %v138_v48  ;;  %v166_v62 = vsub.s32 %v163_v49, %v443_v13 }
  0xe6   :  { %v146_v0 = vrot.slane %v367_v27, %v145_v52  ;;  %v173_v1 = vsub.s32 %v170_v53, %v443_v13  ;;  %v153_v3 = vrot.slane %v367_v27, %v152_v56  ;;  %vm161_vm14 = vcmask 917312  }
  0xe7   :  { %v160_v5 = vrot.slane %v367_v27, %v159_v59  ;;  %v167_v7 = vrot.slane %v367_v27, %v166_v62  ;;  %vm168_vm15 = vcmask 982912   ;;  %vm175_vm0 = vcmask 1048512  }
  0xe8   :  { %v174_v9 = vrot.slane %v367_v27, %v173_v1 }
 0x140   :  { %v62_v33 = vpop.permute.xlu0 %61 }
 0x141   :  { %v71_v37 = vrot.slane %v62_v33, %v70_v22 }
 0x143   :  { %v78_v43 = vsel %vm77_vm2, %v76_v28, %v71_v37 }
 0x144   :  { %v85_v47 = vsel %vm84_vm3, %v83_v31, %v78_v43 }
 0x145   :  { %v92_v51 = vsel %vm91_vm4, %v90_v35, %v85_v47 }
 0x146   :  { %v99_v54 = vsel %vm98_vm5, %v97_v39, %v92_v51 }
 0x147   :  { %v106_v57 = vsel %vm105_vm6, %v104_v42, %v99_v54 }
 0x148   :  { %v113_v60 = vsel %vm112_vm7, %v111_v46, %v106_v57 }
 0x149   :  { %v120_v63 = vsel %vm119_vm8, %v118_v50, %v113_v60 }
 0x14a   :  { %v127_v2 = vsel %vm126_vm9, %v125_v55, %v120_v63 }
 0x14b   :  { %v134_v4 = vsel %vm133_vm10, %v132_v58, %v127_v2 }
 0x14c   :  { %v141_v6 = vsel %vm140_vm11, %v139_v61, %v134_v4 }
 0x14d   :  { %v148_v8 = vsel %vm147_vm12, %v146_v0, %v141_v6 }
 0x14e   :  { %v155_v10 = vsel %vm154_vm13, %v153_v3, %v148_v8 }
 0x14f   :  { %v162_v11 = vsel %vm161_vm14, %v160_v5, %v155_v10 }
 0x150   :  { %v169_v12 = vsel %vm168_vm15, %v167_v7, %v162_v11 }
 0x151   :  { %v176_v13 = vsel %vm175_vm0, %v174_v9, %v169_v12 }
 0x152   :  { %190 = vst [vmem:[#allocation9] sm:$0xff] %v176_v13 }
 0x153   :  { %337 = shalt.err (!%p334_p3)
}
 0x154   :  { %s338_s17 = scalar_lea.hbm %s484_s6, 128 }
 0x155   :  { %p339_p4 = scmp.ne.s32.totalorder %s484_s6, %s338_s17  ;;  %p342_p5 = scmp.lt.u32.totalorder %s338_s17, %s484_s6 }
 0x157   :  { %p344_p6 = pnand %p342_p5, %p339_p4 }
 0x159   :  { %347 = shalt.err (!%p344_p6)
}
 0x15a   :  { %220 = dma.vmem_to_hbm [thread:$0]  %s218_s13, 128, %s484_s6, [#allocation8]  }
 0x15b   :  { %354 = dma.done.wait [#allocation6], 128  }
 0x15c   :  { %355 = vsyncadd [#allocation6], 4294967168 }
 0x15d   :  { %356 = dma.done.wait [#allocation8], 256  }
 0x15e   :  { %357 = vsyncadd [#allocation8], 4294967040 }
 0x15f   :  { %230 = vsyncpa [#allocation6], 1 }
 0x160   :  { %231 = vsyncpa [#allocation8], 1 }

</bundles_post_ra>
